<compile_context>
chip_gen: v7x
topology: tpu7x:2x2x1
jax: 0.10.0
libtpu: 0.0.40
codegen_flags: <defaults>
</compile_context>

<pallas_src>
import jax
import jax.numpy as jnp
from jax.experimental import pallas as pl
from jax.experimental.pallas import tpu as pltpu


def policy_net_kernel(x_ref, b2_ref, w1_ref, w2t_ref, o_ref):
    # x_ref   : VMEM f32[B, S]    per-call input
    # b2_ref  : SMEM f32[A]       fc2 bias (packed once at init)
    # w1_ref  : VMEM f32[S+1, H]  rows 0..S-1 = w1, row S = b1
    # w2t_ref : VMEM f32[A, H]    w2.T (H on the lane axis)
    # o_ref   : VMEM f32[B, A]
    B, S = x_ref.shape
    A = o_ref.shape[1]

    # One load per operand; each is at most one padded (8,128) vreg.
    x = x_ref[...]        # [B, S]
    w1 = w1_ref[...]      # [S+1, H]
    w2 = w2t_ref[...]     # [A, H]

    # fc1 + ReLU, batched over sublanes: h[B, H] via S broadcasted VPU FMAs.
    h = w1[S:S + 1, :]                          # bias row, broadcasts over B
    for k in range(S):                          # S is a tiny compile-time constant
        h = h + x[:, k:k + 1] * w1[k:k + 1, :]
    h = jnp.maximum(h, 0.0)                     # [B, H]

    col = jax.lax.broadcasted_iota(jnp.int32, (B, A), 1)

    if A == 2:
        # softmax over two classes == sigmoid of the logit difference:
        #   p1 = exp(l1) / (exp(l0) + exp(l1)) = 1 / (1 + exp(l0 - l1))
        # -> one VPU multiply + ONE 128-lane XLU reduction for the whole batch.
        w2_diff = w2[0:1, :] - w2[1:2, :]                          # [1, H]
        delta = jnp.sum(h * w2_diff, axis=-1, keepdims=True)       # [B, 1]
        delta = delta + (b2_ref[0] - b2_ref[1])
        p1 = pl.reciprocal(1.0 + jnp.exp(delta))                   # [B, 1]
        probs = jnp.where(col == 0, 1.0 - p1, p1)                  # [B, A]
    else:
        # Generic numerically-stable softmax (A lane reductions over [B, H]).
        logits = jnp.zeros((B, A), jnp.float32)
        for a in range(A):
            la = jnp.sum(h * w2[a:a + 1, :], axis=-1, keepdims=True) + b2_ref[a]
            logits = jnp.where(col == a, la, logits)
        m = jnp.max(logits, axis=-1, keepdims=True)
        e = jnp.exp(logits - m)
        probs = e * pl.reciprocal(jnp.sum(e, axis=-1, keepdims=True))

    # One coalesced store of the whole [B, A] probability tile.
    o_ref[...] = probs.astype(o_ref.dtype)


def _policy_net_call(x, b2_vec, w1_aug, w2t):
    B, S = x.shape
    A, H = w2t.shape
    cost = pl.CostEstimate(
        flops=2 * B * S * H + 2 * B * H + 8 * B * A,
        transcendentals=B * A,
        bytes_accessed=4 * (x.size + b2_vec.size + w1_aug.size + w2t.size + B * A),
    )
    return pl.pallas_call(
        policy_net_kernel,
        out_shape=jax.ShapeDtypeStruct((B, A), jnp.float32),
        in_specs=[
            pl.BlockSpec(memory_space=pltpu.MemorySpace.VMEM),   # x (per call)
            pl.BlockSpec(memory_space=pltpu.MemorySpace.SMEM),   # b2 (static)
            pl.BlockSpec(memory_space=pltpu.MemorySpace.VMEM),   # w1_aug (static)
            pl.BlockSpec(memory_space=pltpu.MemorySpace.VMEM),   # w2t (static)
        ],
        out_specs=pl.BlockSpec(memory_space=pltpu.MemorySpace.VMEM),
        cost_estimate=cost,
    )(x, b2_vec, w1_aug, w2t)


def make_policy_net_forward(w1, b1, w2, b2):
    """Pack parameters ONCE (per perf review: keep reshaping/concats out of the
    per-step path). The returned callable takes only `x`."""
    S, H = w1.shape
    w1_aug = jnp.concatenate(
        [jnp.asarray(w1, jnp.float32), jnp.asarray(b1, jnp.float32).reshape(1, H)],
        axis=0)                                            # [S+1, H]
    w2t = jnp.asarray(w2, jnp.float32).T                   # [A, H] lane-dense
    b2_vec = jnp.asarray(b2, jnp.float32).reshape(-1)      # [A]
    w1_aug, w2t, b2_vec = jax.block_until_ready((w1_aug, w2t, b2_vec))

    call = jax.jit(_policy_net_call)

    def forward(x):
        return call(jnp.asarray(x, jnp.float32), b2_vec, w1_aug, w2t)

    return forward


def reference_forward(x, w1, b1, w2, b2):
    h = jnp.maximum(x @ w1 + b1, 0.0)
    return jax.nn.softmax(h @ w2 + b2, axis=1)


if __name__ == "__main__":
    # CartPole-v1: state_dim=4, action_dim=2, hidden_dim=128
    state_dim, hidden_dim, action_dim = 4, 128, 2
    batch = 2

    key = jax.random.PRNGKey(0)
    kx, kw1, kb1, kw2, kb2 = jax.random.split(key, 5)

    # Deterministic parameter init (PyTorch-Linear-like uniform scale).
    bound1 = 1.0 / jnp.sqrt(state_dim)
    bound2 = 1.0 / jnp.sqrt(hidden_dim)
    w1 = jax.random.uniform(kw1, (state_dim, hidden_dim), jnp.float32, -bound1, bound1)
    b1 = jax.random.uniform(kb1, (1, hidden_dim), jnp.float32, -bound1, bound1)
    w2 = jax.random.uniform(kw2, (hidden_dim, action_dim), jnp.float32, -bound2, bound2)
    b2 = jax.random.uniform(kb2, (1, action_dim), jnp.float32, -bound2, bound2)

    x = jax.random.normal(kx, (batch, state_dim), jnp.float32)

    forward = make_policy_net_forward(w1, b1, w2, b2)   # packing happens here, once
    out = forward(x)                                     # only x per step
    out = jax.block_until_ready(out)

    ref = reference_forward(x, w1, b1, w2, b2)
    assert out.shape == (batch, action_dim)
    assert jnp.allclose(out, ref, atol=1e-5, rtol=1e-5), (out, ref)
    # probabilities must sum to 1 along dim=1
    assert jnp.allclose(jnp.sum(out, axis=1), 1.0, atol=1e-5)

    print("KERNEL_OK")
</pallas_src>

<mosaic_0001>
module attributes {stable_mosaic.version = 11 : i64} {
  func.func @policy_net_kernel(%arg0: memref<2x4xf32, #tpu.memory_space<vmem>>, %arg1: memref<2xf32, #tpu.memory_space<smem>>, %arg2: memref<5x128xf32, #tpu.memory_space<vmem>>, %arg3: memref<2x128xf32, #tpu.memory_space<vmem>>, %arg4: memref<2x2xf32, #tpu.memory_space<vmem>>) attributes {dimension_semantics = [], scalar_prefetch = 0 : i64, scratch_operands = 0 : i64, tpu.core_type = #tpu.core_type<tc>} {
    %c0 = arith.constant 0 : index
    %c0_0 = arith.constant 0 : index
    %0 = vector.load %arg0[%c0, %c0_0] : memref<2x4xf32, #tpu.memory_space<vmem>>, vector<2x4xf32>
    %c0_1 = arith.constant 0 : index
    %c0_2 = arith.constant 0 : index
    %1 = vector.load %arg2[%c0_1, %c0_2] : memref<5x128xf32, #tpu.memory_space<vmem>>, vector<5x128xf32>
    %c0_3 = arith.constant 0 : index
    %c0_4 = arith.constant 0 : index
    %2 = vector.load %arg3[%c0_3, %c0_4] : memref<2x128xf32, #tpu.memory_space<vmem>>, vector<2x128xf32>
    %3 = vector.extract_strided_slice %1 {offsets = [4, 0], sizes = [1, 128], strides = [1, 1]} : vector<5x128xf32> to vector<1x128xf32>
    %4 = vector.extract_strided_slice %0 {offsets = [0, 0], sizes = [2, 1], strides = [1, 1]} : vector<2x4xf32> to vector<2x1xf32>
    %5 = vector.extract_strided_slice %1 {offsets = [0, 0], sizes = [1, 128], strides = [1, 1]} : vector<5x128xf32> to vector<1x128xf32>
    %6 = vector.broadcast %4 : vector<2x1xf32> to vector<2x128xf32>
    %7 = vector.broadcast %5 : vector<1x128xf32> to vector<2x128xf32>
    %8 = arith.mulf %6, %7 : vector<2x128xf32>
    %9 = vector.broadcast %3 : vector<1x128xf32> to vector<2x128xf32>
    %10 = arith.addf %9, %8 : vector<2x128xf32>
    %11 = vector.extract_strided_slice %0 {offsets = [0, 1], sizes = [2, 1], strides = [1, 1]} : vector<2x4xf32> to vector<2x1xf32>
    %12 = vector.extract_strided_slice %1 {offsets = [1, 0], sizes = [1, 128], strides = [1, 1]} : vector<5x128xf32> to vector<1x128xf32>
    %13 = vector.broadcast %11 : vector<2x1xf32> to vector<2x128xf32>
    %14 = vector.broadcast %12 : vector<1x128xf32> to vector<2x128xf32>
    %15 = arith.mulf %13, %14 : vector<2x128xf32>
    %16 = arith.addf %10, %15 : vector<2x128xf32>
    %17 = vector.extract_strided_slice %0 {offsets = [0, 2], sizes = [2, 1], strides = [1, 1]} : vector<2x4xf32> to vector<2x1xf32>
    %18 = vector.extract_strided_slice %1 {offsets = [2, 0], sizes = [1, 128], strides = [1, 1]} : vector<5x128xf32> to vector<1x128xf32>
    %19 = vector.broadcast %17 : vector<2x1xf32> to vector<2x128xf32>
    %20 = vector.broadcast %18 : vector<1x128xf32> to vector<2x128xf32>
    %21 = arith.mulf %19, %20 : vector<2x128xf32>
    %22 = arith.addf %16, %21 : vector<2x128xf32>
    %23 = vector.extract_strided_slice %0 {offsets = [0, 3], sizes = [2, 1], strides = [1, 1]} : vector<2x4xf32> to vector<2x1xf32>
    %24 = vector.extract_strided_slice %1 {offsets = [3, 0], sizes = [1, 128], strides = [1, 1]} : vector<5x128xf32> to vector<1x128xf32>
    %25 = vector.broadcast %23 : vector<2x1xf32> to vector<2x128xf32>
    %26 = vector.broadcast %24 : vector<1x128xf32> to vector<2x128xf32>
    %27 = arith.mulf %25, %26 : vector<2x128xf32>
    %28 = arith.addf %22, %27 : vector<2x128xf32>
    %cst = arith.constant 0.000000e+00 : f32
    %29 = vector.broadcast %cst : f32 to vector<2x128xf32>
    %30 = arith.maximumf %28, %29 : vector<2x128xf32>
    %31 = tpu.iota {dimensions = array<i32: 1>} : vector<2x2xi32>
    %32 = vector.extract_strided_slice %2 {offsets = [0, 0], sizes = [1, 128], strides = [1, 1]} : vector<2x128xf32> to vector<1x128xf32>
    %33 = vector.extract_strided_slice %2 {offsets = [1, 0], sizes = [1, 128], strides = [1, 1]} : vector<2x128xf32> to vector<1x128xf32>
    %34 = arith.subf %32, %33 : vector<1x128xf32>
    %35 = vector.broadcast %34 : vector<1x128xf32> to vector<2x128xf32>
    %36 = arith.mulf %30, %35 : vector<2x128xf32>
    %cst_5 = arith.constant dense<0.000000e+00> : vector<2xf32>
    %37 = vector.multi_reduction <add>, %36, %cst_5 [1] : vector<2x128xf32> to vector<2xf32>
    %38 = vector.shape_cast %37 : vector<2xf32> to vector<2x1xf32>
    %c0_6 = arith.constant 0 : index
    %39 = memref.load %arg1[%c0_6] : memref<2xf32, #tpu.memory_space<smem>>
    %c1 = arith.constant 1 : index
    %40 = memref.load %arg1[%c1] : memref<2xf32, #tpu.memory_space<smem>>
    %41 = arith.subf %39, %40 : f32
    %42 = vector.broadcast %41 : f32 to vector<2x1xf32>
    %43 = arith.addf %38, %42 : vector<2x1xf32>
    %44 = math.exp %43 : vector<2x1xf32>
    %cst_7 = arith.constant 1.000000e+00 : f32
    %45 = vector.broadcast %cst_7 : f32 to vector<2x1xf32>
    %46 = arith.addf %45, %44 : vector<2x1xf32>
    %47 = tpu.reciprocal %46 : vector<2x1xf32> -> vector<2x1xf32>
    %c0_i32 = arith.constant 0 : i32
    %48 = vector.broadcast %c0_i32 : i32 to vector<2x2xi32>
    %49 = arith.cmpi eq, %31, %48 : vector<2x2xi32>
    %cst_8 = arith.constant 1.000000e+00 : f32
    %50 = vector.broadcast %cst_8 : f32 to vector<2x1xf32>
    %51 = arith.subf %50, %47 : vector<2x1xf32>
    %52 = vector.shape_cast %51 : vector<2x1xf32> to vector<2x1xf32>
    %53 = vector.broadcast %52 : vector<2x1xf32> to vector<2x2xf32>
    %54 = vector.shape_cast %47 : vector<2x1xf32> to vector<2x1xf32>
    %55 = vector.broadcast %54 : vector<2x1xf32> to vector<2x2xf32>
    %56 = arith.select %49, %53, %55 : vector<2x2xi1>, vector<2x2xf32>
    %c0_9 = arith.constant 0 : index
    %c0_10 = arith.constant 0 : index
    %57 = vector.load %arg4[%c0_9, %c0_10] : memref<2x2xf32, #tpu.memory_space<vmem>>, vector<2x2xf32>
    tpu.vector_store %arg4[%c0_9, %c0_10], %56 {strides = array<i32>} : memref<2x2xf32, #tpu.memory_space<vmem>>, vector<2x2xf32>,
    return
  }
}

</mosaic_0001>

<bundles_post_ra>
// kernel: _policy_net_call.1
= control target key start
LH: loop header
LB: loop body
LE: loop exit
PB: predicated region body
PF: predicated region fallthrough
CT: control target
= control target key end

     0   :  { %9 = vsyncpa [#allocation3], 0  ;;  %s329_s0 = inlined_call_operand.hbm [shape: f32[2,4], index: 0, kind: input, shape index: {}]   ;;  %s330_s1 = inlined_call_operand.vmem [shape: f32[2], index: 1, kind: input, shape index: {}]   ;;  %s331_s2 = inlined_call_operand.hbm [shape: f32[5,128], index: 2, kind: input, shape index: {}]   ;;  %s332_s3 = inlined_call_operand.vmem [shape: f32[2,128], index: 3, kind: input, shape index: {}]   ;;  %s333_s4 = inlined_call_operand.hbm [shape: f32[2,2], index: 4, kind: output, shape index: {}]  }
   0x1   :  { %10 = vsyncpa [#allocation5], 0 }
   0x2   :  { %11 = vsyncpa [#allocation8], 0 }
   0x3   :  { %12 = vsyncpa [#allocation4], 0  ;;  %s29_s17 = sshll.u32 %s330_s1, 4  ;;  %s254_s18 = smov [#allocation2]   ;;  %s30_s17 = int_to_ptr.vmem [resolvable:$true] %s29_s17 }
   0x4   :  { %s19_s19 = sshll.u32 %s254_s18, 4  ;;  %s168_s22 = scalar_lea.hbm %s329_s0, 32  ;;  %s20_s19 = int_to_ptr.vmem [resolvable:$true] %s19_s19 }
   0x5   :  { %p169_p0 = scmp.ne.s32.totalorder %s329_s0, %s168_s22  ;;  %p172_p1 = scmp.lt.u32.totalorder %s168_s22, %s329_s0 }
   0x7   :  { %p174_p2 = pnand %p172_p1, %p169_p0 }
   0x9   :  { %177 = shalt.err (!%p174_p2)
}
   0xa   :  { %s178_s27 = scalar_lea.vmem %s20_s19, 32  ;;  %p183_p4 = scmp.lt.s32.totalorder %s20_s19, %s20_s19 }
   0xb   :  { %p179_p3 = scmp.ne.s32.totalorder %s20_s19, %s178_s27  ;;  %p184_p5 = scmp.lt.s32.totalorder %s178_s27, %s178_s27 }
   0xd   :  { %p185_p6 = por %p184_p5, %p183_p4 }
   0xf   :  { %p186_p7 = pnand %p185_p6, %p179_p3 }
  0x11   :  { %189 = shalt.err (!%p186_p7)
}
  0x12   :  { %22 = dma.hbm_to_vmem [thread:$0]  %s329_s0, 32, %s20_s19, [#allocation3]  }
  0x13   :  { %s190_s29 = scalar_lea.vmem %s30_s17, 16  ;;  %p195_p9 = scmp.lt.s32.totalorder %s30_s17, %s30_s17 }
  0x14   :  { %p191_p8 = scmp.ne.s32.totalorder %s30_s17, %s190_s29  ;;  %p196_p10 = scmp.lt.s32.totalorder %s190_s29, %s190_s29 }
  0x16   :  { %p197_p11 = por %p196_p10, %p195_p9 }
  0x18   :  { %p198_p12 = pnand %p197_p11, %p191_p8 }
  0x1a   :  { %201 = shalt.err (!%p198_p12)
}
  0x1b   :  { %s255_s30 = smov [#allocation6]   ;;  %s256_s5 = smov [#allocation7]  }
  0x1c   :  { %32 = dma.vmem_to_smem %s30_s17, 16, %s255_s30, [#allocation5]  }
  0x1d   :  { %s39_s6 = sshll.u32 %s256_s5, 4  ;;  %s202_s9 = scalar_lea.hbm %s331_s2, 128  ;;  %s40_s6 = int_to_ptr.vmem [resolvable:$true] %s39_s6 }
  0x1e   :  { %p203_p13 = scmp.ne.s32.totalorder %s331_s2, %s202_s9  ;;  %p206_p0 = scmp.lt.u32.totalorder %s202_s9, %s331_s2 }
  0x20   :  { %p208_p1 = pnand %p206_p0, %p203_p13 }
  0x22   :  { %211 = shalt.err (!%p208_p1)
}
  0x23   :  { %s212_s13 = scalar_lea.vmem %s40_s6, 128  ;;  %p217_p3 = scmp.lt.s32.totalorder %s40_s6, %s40_s6 }
  0x24   :  { %p213_p2 = scmp.ne.s32.totalorder %s40_s6, %s212_s13  ;;  %p218_p4 = scmp.lt.s32.totalorder %s212_s13, %s212_s13 }
  0x26   :  { %p219_p5 = por %p218_p4, %p217_p3 }
  0x28   :  { %p220_p6 = pnand %p219_p5, %p213_p2 }
  0x2a   :  { %223 = shalt.err (!%p220_p6)
}
  0x2b   :  { %42 = dma.hbm_to_vmem [thread:$0]  %s331_s2, 128, %s40_s6, [#allocation8]  }
  0x2c   :  { %246 = dma.done.wait [#allocation3], 32  }
  0x2d   :  { %247 = vsyncadd [#allocation3], 4294967264 }
  0x2e   :  { %248 = dma.done.wait [#allocation5], 16  }
  0x2f   :  { %249 = vsyncadd [#allocation5], 4294967280 }
  0x30   :  { %250 = dma.done.wait [#allocation8], 128  }
  0x31   :  { %251 = vsyncadd [#allocation8], 4294967168 }
  0x32   :  { %54 = sfence }
  0x33   :  { %v55_v0 = vld [vmem:[#allocation2] sm:$0x3]  ;;  %v257_v1 = vmov 0   ;;  %v258_v2 = vmov 2   ;;  %v259_v3 = vmov 1   ;;  %v260_v4 = vmov 3  }
  0x34   :  { %159 = vset.pattern.permute.xlu0 %v257_v1  ;;  %161 = vset.pattern.permute.xlu1 %v258_v2  ;;  %v63_v5 = vlaneseq  ;;  %v56_v8 = vld [vmem:[#allocation7] sm:$0x1f]  ;;  %v57_v16 = vld [vmem:[%s332_s3] sm:$0x3]  ;;  %vm115_vm0 = vcmask 1041408   ;;  %s119_s3 = sld [smem:[#allocation6]] }
  0x35   :  { %60 = vperm.xlu0 %159, %v55_v0   ;;  %84 = vperm.xlu1 %161, %v55_v0   ;;  %v107_v22 = vrot.slane %v57_v16, 1  ;;  %s150_s17 = sld [smem:[#allocation6 + $0x1]]  ;;  %s261_s19 = smov [#allocation9]   ;;  %vm131_vm2 = vcmask 9216  }
  0x36   :  { %v64_v6 = vshrl.u32 %v63_v5, 7  ;;  %v105_v43 = vand.u32 127, %v63_v5  ;;  %s139_s20 = sshll.u32 %s261_s19, 4  ;;  %s140_s20 = int_to_ptr.vmem [resolvable:$true] %s139_s20 }
  0x37   :  { %v109_v30 = vsub.f32 %v57_v16, %v107_v22  ;;  %s224_s21 = scalar_lea.vmem %s140_s20, 32  ;;  %p229_p8 = scmp.lt.s32.totalorder %s140_s20, %s140_s20 }
  0x38   :  { %v65_v7 = vsub.s32 0, %v64_v6  ;;  %v70_v10 = vsub.s32 4, %v64_v6  ;;  %v79_v11 = vsub.s32 1, %v64_v6  ;;  %v89_v13 = vsub.s32 2, %v64_v6  ;;  %p225_p7 = scmp.ne.s32.totalorder %s140_s20, %s224_s21  ;;  %p230_p9 = scmp.lt.s32.totalorder %s224_s21, %s224_s21 }
  0x39   :  { %160 = vset.pattern.permute.xlu0 %v259_v3  ;;  %162 = vset.pattern.permute.xlu1 %v260_v4  ;;  %v99_v15 = vsub.s32 3, %v64_v6  ;;  %vm128_vm1 = vcmp.eq.s32.totalorder %v105_v43, 0 }
  0x3a   :  { %74 = vperm.xlu0 %160, %v55_v0   ;;  %94 = vperm.xlu1 %162, %v55_v0   ;;  %v66_v9 = vrot.slane %v56_v8, %v65_v7  ;;  %v71_v17 = vrot.slane %v56_v8, %v70_v10  ;;  %v80_v19 = vrot.slane %v56_v8, %v79_v11  ;;  %p231_p10 = por %p230_p9, %p229_p8 }
  0x3b   :  { %v90_v20 = vrot.slane %v56_v8, %v89_v13  ;;  %v100_v21 = vrot.slane %v56_v8, %v99_v15  ;;  %v113_v33 = vrot.slane %v109_v30, %v65_v7  ;;  %s121_s18 = ssub.f32 %s119_s3, %s150_s17 }
  0x3c   :  { %p232_p11 = pnand %p231_p10, %p225_p7 }
  0x3d   :  { %v122_v37 = vstv %s121_s18 }
  0x3e   :  { %163 = vset.pattern.permute.xlu0 %v260_v4 }
  0xb4   :  { %v61_v12 = vpop.permute.xlu0 %60  ;;  %v85_v14 = vpop.permute.xlu1 %84 }
  0xb5   :  { %v67_v18 = vmul.f32 %v66_v9, %v61_v12  ;;  %v91_v27 = vmul.f32 %v90_v20, %v85_v14 }
  0xb7   :  { %v72_v25 = vadd.f32 %v71_v17, %v67_v18 }
  0xb9   :  { %v75_v23 = vpop.permute.xlu0 %74  ;;  %v95_v24 = vpop.permute.xlu1 %94 }
  0xba   :  { %v81_v26 = vmul.f32 %v80_v19, %v75_v23  ;;  %v101_v29 = vmul.f32 %v100_v21, %v95_v24 }
  0xbc   :  { %v82_v28 = vadd.f32 %v81_v26, %v72_v25 }
  0xbe   :  { %v92_v31 = vadd.f32 %v91_v27, %v82_v28 }
  0xc0   :  { %v102_v32 = vadd.f32 %v101_v29, %v92_v31 }
  0xc2   :  { %v103_v34 = vmax.f32 %v102_v32, 0.0 }
  0xc4   :  { %v114_v35 = vmul.f32 %v113_v33, %v103_v34 }
  0xc6   :  { %v116_v36 = vsel %vm115_vm0, %v114_v35, 0.0 }
  0xc7   :  { %117 = vadd.xlane.f32.xlu1 %v116_v36 }
 0x154   :  { %v118_v38 = vpop.xlane.xlu1 %117 }
 0x155   :  { %v123_v39 = vadd.f32 %v122_v37, %v118_v38 }
 0x157   :  { %v124_v40 = vmul.f32 1.442695, %v123_v39 }
 0x159   :  { %164 = vpow2.f32 %v124_v40 }
 0x163   :  { %v165_v41 = vpop.eup %164 }
 0x164   :  { %v126_v42 = vadd.f32 1.0, %v165_v41 }
 0x166   :  { %166 = vrcp.f32 %v126_v42 }
 0x170   :  { %v167_v44 = vpop.eup %166 }
 0x171   :  { %v129_v45 = vsub.f32 1.0, %v167_v44 }
 0x173   :  { %v130_v46 = vsel %vm128_vm1, %v129_v45, %v167_v44 }
 0x174   :  { %132 = vst.msk [vmem:[#allocation9] sm:$0x3] %vm131_vm2, %v130_v46 }
 0x175   :  { %235 = shalt.err (!%p232_p11)
}
 0x176   :  { %s236_s24 = scalar_lea.hbm %s333_s4, 32 }
 0x177   :  { %p237_p12 = scmp.ne.s32.totalorder %s333_s4, %s236_s24  ;;  %p240_p13 = scmp.lt.u32.totalorder %s236_s24, %s333_s4 }
 0x179   :  { %p242_p0 = pnand %p240_p13, %p237_p12 }
 0x17b   :  { %245 = shalt.err (!%p242_p0)
}
 0x17c   :  { %142 = dma.vmem_to_hbm [thread:$0]  %s140_s20, 32, %s333_s4, [#allocation4]  }
 0x17d   :  { %252 = dma.done.wait [#allocation4], 32  }
 0x17e   :  { %253 = vsyncadd [#allocation4], 4294967264 }
 0x17f   :  { %146 = vsyncpa [#allocation3], 1 }
 0x180   :  { %147 = vsyncpa [#allocation8], 1 }
 0x181   :  { %148 = vsyncpa [#allocation4], 1 }
 0x182   :  { %149 = vsyncpa [#allocation5], 1 }

</bundles_post_ra>
